<compile_context>
chip_gen: v7x
topology: tpu7x:2x2x1
jax: 0.10.0
libtpu: 0.0.40
codegen_flags: <defaults>
</compile_context>

<pallas_src>
import jax
import jax.numpy as jnp
from jax.experimental import pallas as pl
from jax.experimental.pallas import tpu as pltpu

KH = KW = 3  # 3x3 conv, stride 1, padding 1


def _dual_conv_relu_kernel(x_ref, y_ref, w_ref, b_ref, ox_ref, oy_ref):
    """Shared Conv2d(3x3, pad=1) + ReLU applied to an x-block and a y-block.

    x_ref, y_ref  : (Bt, H, W*Cin)      lane-dense activation blocks (bf16)
    w_ref         : (KH*W*Cin, W*Cout)  dy/dx-folded block-banded weight (bf16)
    b_ref         : (1, W*Cout)         bias tiled across W (f32)
    ox_ref, oy_ref: (Bt, H, W*Cout)     lane-dense outputs
    """
    Bt, H, WCin = x_ref.shape
    WCout = w_ref.shape[-1]

    # Shared weights for both streams -> stack them on the matmul M dimension.
    # Axis 0 is a plain vreg-batch dim: no lane/sublane movement, 2x M fill.
    v = jnp.concatenate([x_ref[...], y_ref[...]], axis=0)            # (2Bt,H,WCin)

    # Height halo (padding=1 along H) built in vregs: the zero rows come from
    # the concatenation itself, so there is no pad scratch and nothing to zero
    # per grid step.  Staged in f32 so the off-by-one sublane shifts run on
    # unpacked 32-bit data (robust lowering); this is a handful of vreg
    # pack/unpack ops and the MXU still consumes bf16.
    vf = v.astype(jnp.float32)
    zrow = jnp.zeros((2 * Bt, 1, WCin), jnp.float32)
    up = jnp.concatenate([zrow, vf[:, :H - 1, :]], axis=1)    # row h -> in[h-1]
    down = jnp.concatenate([vf[:, 1:, :], zrow], axis=1)      # row h -> in[h+1]

    # dy folded into the contraction dim: ONE lane-dense K = KH*W*Cin matmul
    # (bf16 operands, f32 accumulation) instead of KH underfilled K=W*Cin ones.
    slab = jnp.concatenate([up, vf, down], axis=-1)           # (2Bt,H,KH*WCin)
    slab = slab.reshape(2 * Bt * H, KH * WCin).astype(w_ref.dtype)
    acc = jnp.dot(slab, w_ref[...], preferred_element_type=jnp.float32)

    # Bias + ReLU in f32 on the VPU, then lane-dense full-width (W*Cout = 128)
    # unmasked stores, one per stream (same computation / same weights).
    out = jnp.maximum(acc + b_ref[...], 0.0)
    out = out.reshape(2 * Bt, H, WCout).astype(ox_ref.dtype)
    ox_ref[...] = out[:Bt]
    oy_ref[...] = out[Bt:]


def prepare_dual_stream_params(weight_oihw, bias, width, *, mxu_dtype=jnp.bfloat16):
    """One-time weight folding -- hoisted out of the per-forward path.

    weight_oihw: (Cout, Cin, KH, KW)  -- PyTorch Conv2d layout.
    bias       : (Cout,)
    Returns
      wflat   : (KH*W*Cin, W*Cout) banded matmul weight, mxu_dtype
      bias_big: (1, W*Cout) f32, bias tiled across the width dimension.

    wflat[dy*W*Cin + wi*Cin + ci, wo*Cout + co] = weight[co, ci, dy, wi-wo+1]
    when 0 <= wi-wo+1 < KW, else 0: the KW (dx) taps AND the width zero-padding
    are folded into a block-banded matrix, and the KH (dy) taps are stacked
    along the contraction dim so the kernel needs a single matmul.
    TODO(synk): wflat is O(W^2*Cin*Cout); for large W tile the output width
    (only KW*Cin rows per width block are nonzero) or revert to per-tap
    matmuls so it stays inside v7x's 64 MiB VMEM.
    """
    Cout, Cin, kh, kw = weight_oihw.shape
    assert (kh, kw) == (KH, KW), "kernel is specialized to 3x3, padding=1"
    W = int(width)
    w = jnp.transpose(weight_oihw, (2, 3, 1, 0)).astype(jnp.float32)  # (KH,KW,Cin,Cout)
    wi = jnp.arange(W)[:, None, None]
    wo = jnp.arange(W)[None, :, None]
    dx = jnp.arange(KW)[None, None, :]
    sel = (wi == wo + dx - 1).astype(jnp.float32)                  # (W, W, KW)
    wband = jnp.einsum("abd,ydio->yaibo", sel, w)                  # (KH,W,Cin,W,Cout)
    wflat = wband.reshape(KH * W * Cin, W * Cout).astype(mxu_dtype)
    bias_big = jnp.tile(bias.astype(jnp.float32), W).reshape(1, W * Cout)
    return wflat, bias_big


def dual_stream_conv_relu_lane(x_lane, y_lane, wflat, bias_big, *,
                               out_dtype=jnp.float32, batch_block=None):
    """Pallas entry point on lane-dense activations (no layout plumbing).

    x_lane, y_lane: (N, H, W*Cin) -- NHWC reshaped so the last dim is W*Cin.
    Returns two (N, H, W*Cout) arrays (same shared weights on both streams).
    """
    N, H, WCin = x_lane.shape
    assert y_lane.shape == x_lane.shape
    K, WCout = wflat.shape
    assert K == KH * WCin
    assert bias_big.shape == (1, WCout)

    # Single grid step by default: v5e/v6e have one TensorCore, so extra grid
    # steps are pure ~0.35us overhead and shrink matmul M.
    # TODO(synk): for large N on v7x, pass batch_block=N//2 together with
    # dimension_semantics=(pltpu.CORE_PARALLEL,) to shard across both cores.
    Bt = N if batch_block is None else max(1, min(int(batch_block), N))
    nb = pl.cdiv(N, Bt)

    itemsize_in = jnp.dtype(x_lane.dtype).itemsize
    itemsize_out = jnp.dtype(out_dtype).itemsize
    cost = pl.CostEstimate(
        # FLOPs of the banded matmul actually executed (not the logical conv).
        flops=2 * (2 * N * H) * K * WCout,
        transcendentals=0,
        bytes_accessed=(2 * N * H * WCin * itemsize_in            # x + y in
                        + 2 * N * H * WCout * itemsize_out        # two outputs
                        + wflat.size * jnp.dtype(wflat.dtype).itemsize
                        + bias_big.size * 4),
    )

    act_spec = pl.BlockSpec((Bt, H, WCin), lambda b: (b, 0, 0))
    out_spec = pl.BlockSpec((Bt, H, WCout), lambda b: (b, 0, 0))
    out_shape = (jax.ShapeDtypeStruct((N, H, WCout), out_dtype),
                 jax.ShapeDtypeStruct((N, H, WCout), out_dtype))

    return pl.pallas_call(
        _dual_conv_relu_kernel,
        out_shape=out_shape,
        grid_spec=pltpu.PrefetchScalarGridSpec(
            num_scalar_prefetch=0,
            grid=(nb,),
            in_specs=[
                act_spec,                                           # x block
                act_spec,                                           # y block
                pl.BlockSpec((K, WCout), lambda b: (0, 0)),         # folded weight
                pl.BlockSpec((1, WCout), lambda b: (0, 0)),         # tiled bias
            ],
            out_specs=[out_spec, out_spec],
        ),
        compiler_params=pltpu.CompilerParams(
            dimension_semantics=("arbitrary",)),
        cost_estimate=cost,
    )(x_lane, y_lane, wflat, bias_big)


def dual_stream_block(x_nchw, y_nchw, wflat, bias_big, *,
                      act_dtype=jnp.bfloat16, batch_block=None):
    """DualStreamBlock(Conv2d(Cin,Cout,3,padding=1), ReLU()) forward.

    Applies the SAME (shared-weight) conv+ReLU stack to both streams and
    returns (seq(x), seq(y)) in the module's NCHW layout.  `wflat`/`bias_big`
    come from prepare_dual_stream_params (one-time, hoisted).
    """
    N, Cin, H, W = x_nchw.shape
    assert y_nchw.shape == x_nchw.shape
    WCout = bias_big.shape[-1]
    Cout = WCout // W

    # NCHW (PyTorch module API) -> lane-dense (N, H, W*Cin); the bf16 cast is
    # fused with this boundary transpose.
    # TODO(synk): keep the surrounding model in the lane-dense layout end-to-end
    # (call dual_stream_conv_relu_lane directly) to drop these boundary
    # transpose passes entirely.
    x_l = jnp.transpose(x_nchw, (0, 2, 3, 1)).reshape(N, H, W * Cin).astype(act_dtype)
    y_l = jnp.transpose(y_nchw, (0, 2, 3, 1)).reshape(N, H, W * Cin).astype(act_dtype)

    ox, oy = dual_stream_conv_relu_lane(
        x_l, y_l, wflat, bias_big,
        out_dtype=x_nchw.dtype, batch_block=batch_block)

    # Free reshape back to NHWC, then one transpose pass to the PyTorch NCHW API.
    ox = jnp.transpose(ox.reshape(N, H, W, Cout), (0, 3, 1, 2))
    oy = jnp.transpose(oy.reshape(N, H, W, Cout), (0, 3, 1, 2))
    return ox, oy


def _reference(x_nchw, weight_oihw, bias, cast_dtype=None):
    """Plain-JAX NCHW conv(3x3, pad=1) + bias + ReLU reference."""
    if cast_dtype is not None:
        x_nchw = x_nchw.astype(cast_dtype).astype(jnp.float32)
        weight_oihw = weight_oihw.astype(cast_dtype).astype(jnp.float32)
    out = jax.lax.conv_general_dilated(
        x_nchw, weight_oihw, window_strides=(1, 1), padding="SAME",
        dimension_numbers=("NCHW", "OIHW", "NCHW"),
        preferred_element_type=jnp.float32)
    return jnp.maximum(out + bias.reshape(1, -1, 1, 1), 0.0)


if __name__ == "__main__":
    # Small shapes: batch=2, Cin=4, spatial=16x16, Cout=8.
    N, Cin, H, W = 2, 4, 16, 16
    Cout = 8

    key = jax.random.PRNGKey(0)
    kx, ky, kw_, kb = jax.random.split(key, 4)

    x = jax.random.normal(kx, (N, Cin, H, W), dtype=jnp.float32)
    y = jax.random.normal(ky, (N, Cin, H, W), dtype=jnp.float32)
    weight = 0.1 * jax.random.normal(kw_, (Cout, Cin, KH, KW), dtype=jnp.float32)
    bias = 0.05 * jax.random.normal(kb, (Cout,), dtype=jnp.float32)

    # One-time weight folding, hoisted out of the per-forward path.
    wflat, bias_big = prepare_dual_stream_params(weight, bias, W)

    out_x, out_y = dual_stream_block(x, y, wflat, bias_big)
    out_x = jax.block_until_ready(out_x)
    out_y = jax.block_until_ready(out_y)
    assert out_x.shape == (N, Cout, H, W) and out_y.shape == (N, Cout, H, W)

    # Operand-consistent check: reference fed the same bf16-rounded operands
    # (the kernel uses bf16 MXU operands with f32 accumulation).
    ref_x = _reference(x, weight, bias, cast_dtype=jnp.bfloat16)
    ref_y = _reference(y, weight, bias, cast_dtype=jnp.bfloat16)
    assert jnp.allclose(out_x, ref_x, atol=2e-3, rtol=2e-3)
    assert jnp.allclose(out_y, ref_y, atol=2e-3, rtol=2e-3)

    # Loose sanity check against the full-f32 reference (bf16 rounding only).
    ref_x32 = _reference(x, weight, bias)
    ref_y32 = _reference(y, weight, bias)
    assert jnp.allclose(out_x, ref_x32, atol=5e-2, rtol=5e-2)
    assert jnp.allclose(out_y, ref_y32, atol=5e-2, rtol=5e-2)

    print("KERNEL_OK")
</pallas_src>

<mosaic_0001>
module attributes {stable_mosaic.version = 11 : i64} {
  func.func @_dual_conv_relu_kernel(%arg0: i32, %arg1: memref<2x16x64xbf16, #tpu.memory_space<vmem>>, %arg2: memref<2x16x64xbf16, #tpu.memory_space<vmem>>, %arg3: memref<192x128xbf16, #tpu.memory_space<vmem>>, %arg4: memref<1x128xf32, #tpu.memory_space<vmem>>, %arg5: memref<2x16x128xf32, #tpu.memory_space<vmem>>, %arg6: memref<2x16x128xf32, #tpu.memory_space<vmem>>) attributes {dimension_semantics = [#tpu.dimension_semantics<arbitrary>], iteration_bounds = array<i64: 1>, scalar_prefetch = 0 : i64, scratch_operands = 0 : i64, tpu.core_type = #tpu.core_type<tc>, window_params = [{transform_indices = @transform_0, window_bounds = array<i64: 2, 16, 64>}, {transform_indices = @transform_1, window_bounds = array<i64: 2, 16, 64>}, {pipeline_mode = #tpu.pipeline_mode<synchronous>, transform_indices = @transform_2, window_bounds = array<i64: 192, 128>}, {pipeline_mode = #tpu.pipeline_mode<synchronous>, transform_indices = @transform_3, window_bounds = array<i64: 1, 128>}, {transform_indices = @transform_4, window_bounds = array<i64: 2, 16, 128>}, {transform_indices = @transform_5, window_bounds = array<i64: 2, 16, 128>}]} {
    %c0 = arith.constant 0 : index
    %c0_0 = arith.constant 0 : index
    %c0_1 = arith.constant 0 : index
    %0 = vector.load %arg1[%c0, %c0_0, %c0_1] : memref<2x16x64xbf16, #tpu.memory_space<vmem>>, vector<2x16x64xbf16>
    %c0_2 = arith.constant 0 : index
    %c0_3 = arith.constant 0 : index
    %c0_4 = arith.constant 0 : index
    %1 = vector.load %arg2[%c0_2, %c0_3, %c0_4] : memref<2x16x64xbf16, #tpu.memory_space<vmem>>, vector<2x16x64xbf16>
    %2 = tpu.concatenate %0, %1 in 0 : vector<2x16x64xbf16>, vector<2x16x64xbf16> -> vector<4x16x64xbf16>
    %3 = arith.extf %2 : vector<4x16x64xbf16> to vector<4x16x64xf32>
    %cst = arith.constant 0.000000e+00 : f32
    %4 = vector.broadcast %cst : f32 to vector<4x1x64xf32>
    %5 = vector.extract_strided_slice %3 {offsets = [0, 0, 0], sizes = [4, 15, 64], strides = [1, 1, 1]} : vector<4x16x64xf32> to vector<4x15x64xf32>
    %6 = tpu.concatenate %4, %5 in 1 : vector<4x1x64xf32>, vector<4x15x64xf32> -> vector<4x16x64xf32>
    %7 = vector.extract_strided_slice %3 {offsets = [0, 1, 0], sizes = [4, 15, 64], strides = [1, 1, 1]} : vector<4x16x64xf32> to vector<4x15x64xf32>
    %8 = tpu.concatenate %7, %4 in 1 : vector<4x15x64xf32>, vector<4x1x64xf32> -> vector<4x16x64xf32>
    %9 = tpu.concatenate %6, %3, %8 in 2 : vector<4x16x64xf32>, vector<4x16x64xf32>, vector<4x16x64xf32> -> vector<4x16x192xf32>
    %10 = vector.shape_cast %9 : vector<4x16x192xf32> to vector<64x192xf32>
    %11 = arith.truncf %10 : vector<64x192xf32> to vector<64x192xbf16>
    %c0_5 = arith.constant 0 : index
    %c0_6 = arith.constant 0 : index
    %12 = vector.load %arg3[%c0_5, %c0_6] : memref<192x128xbf16, #tpu.memory_space<vmem>>, vector<192x128xbf16>
    %cst_7 = arith.constant dense<0.000000e+00> : vector<64x128xf32>
    %13 = tpu.matmul %11, %12, %cst_7 {dimension_numbers = #tpu.dot_dimension_numbers<[1], [0], [0], [1], [0, 0, 1, 1], [], []>} : vector<64x192xbf16>, vector<192x128xbf16>, vector<64x128xf32> -> vector<64x128xf32>
    %c0_8 = arith.constant 0 : index
    %c0_9 = arith.constant 0 : index
    %14 = vector.load %arg4[%c0_8, %c0_9] : memref<1x128xf32, #tpu.memory_space<vmem>>, vector<1x128xf32>
    %15 = vector.broadcast %14 : vector<1x128xf32> to vector<64x128xf32>
    %16 = arith.addf %13, %15 : vector<64x128xf32>
    %cst_10 = arith.constant 0.000000e+00 : f32
    %17 = vector.broadcast %cst_10 : f32 to vector<64x128xf32>
    %18 = arith.maximumf %16, %17 : vector<64x128xf32>
    %19 = vector.shape_cast %18 : vector<64x128xf32> to vector<4x16x128xf32>
    %20 = vector.extract_strided_slice %19 {offsets = [0, 0, 0], sizes = [2, 16, 128], strides = [1, 1, 1]} : vector<4x16x128xf32> to vector<2x16x128xf32>
    %c0_11 = arith.constant 0 : index
    %c0_12 = arith.constant 0 : index
    %c0_13 = arith.constant 0 : index
    %21 = vector.load %arg5[%c0_11, %c0_12, %c0_13] : memref<2x16x128xf32, #tpu.memory_space<vmem>>, vector<2x16x128xf32>
    tpu.vector_store %arg5[%c0_11, %c0_12, %c0_13], %20 {strides = array<i32>} : memref<2x16x128xf32, #tpu.memory_space<vmem>>, vector<2x16x128xf32>,
    %22 = vector.extract_strided_slice %19 {offsets = [2, 0, 0], sizes = [2, 16, 128], strides = [1, 1, 1]} : vector<4x16x128xf32> to vector<2x16x128xf32>
    %c0_14 = arith.constant 0 : index
    %c0_15 = arith.constant 0 : index
    %c0_16 = arith.constant 0 : index
    %23 = vector.load %arg6[%c0_14, %c0_15, %c0_16] : memref<2x16x128xf32, #tpu.memory_space<vmem>>, vector<2x16x128xf32>
    tpu.vector_store %arg6[%c0_14, %c0_15, %c0_16], %22 {strides = array<i32>} : memref<2x16x128xf32, #tpu.memory_space<vmem>>, vector<2x16x128xf32>,
    return
  }
  func.func @transform_0(%arg0: i32) -> (i32, i32, i32) {
    %c0_i32 = arith.constant 0 : i32
    %c0_i32_0 = arith.constant 0 : i32
    %c0_i32_1 = arith.constant 0 : i32
    return %arg0, %c0_i32, %c0_i32_0 : i32, i32, i32
  }
  func.func @transform_1(%arg0: i32) -> (i32, i32, i32) {
    %c0_i32 = arith.constant 0 : i32
    %c0_i32_0 = arith.constant 0 : i32
    %c0_i32_1 = arith.constant 0 : i32
    return %arg0, %c0_i32, %c0_i32_0 : i32, i32, i32
  }
  func.func @transform_2(%arg0: i32) -> (i32, i32) {
    %c0_i32 = arith.constant 0 : i32
    %c0_i32_0 = arith.constant 0 : i32
    %c0_i32_1 = arith.constant 0 : i32
    return %c0_i32, %c0_i32_0 : i32, i32
  }
  func.func @transform_3(%arg0: i32) -> (i32, i32) {
    %c0_i32 = arith.constant 0 : i32
    %c0_i32_0 = arith.constant 0 : i32
    %c0_i32_1 = arith.constant 0 : i32
    return %c0_i32, %c0_i32_0 : i32, i32
  }
  func.func @transform_4(%arg0: i32) -> (i32, i32, i32) {
    %c0_i32 = arith.constant 0 : i32
    %c0_i32_0 = arith.constant 0 : i32
    %c0_i32_1 = arith.constant 0 : i32
    return %arg0, %c0_i32, %c0_i32_0 : i32, i32, i32
  }
  func.func @transform_5(%arg0: i32) -> (i32, i32, i32) {
    %c0_i32 = arith.constant 0 : i32
    %c0_i32_0 = arith.constant 0 : i32
    %c0_i32_1 = arith.constant 0 : i32
    return %arg0, %c0_i32, %c0_i32_0 : i32, i32, i32
  }
}

</mosaic_0001>

<bundles_post_ra>
// kernel: tpu_custom_call.1
= control target key start
LH: loop header
LB: loop body
LE: loop exit
PB: predicated region body
PF: predicated region fallthrough
CT: control target
= control target key end

     0   :  { %11 = vsyncpa [#allocation3], 0  ;;  %s885_s0 = inlined_call_operand.hbm [shape: bf16[2,16,64], index: 0, kind: input, shape index: {}]   ;;  %s886_s1 = inlined_call_operand.hbm [shape: bf16[2,16,64], index: 1, kind: input, shape index: {}]   ;;  %s887_s2 = inlined_call_operand.hbm [shape: bf16[192,128], index: 2, kind: input, shape index: {}]   ;;  %s888_s3 = inlined_call_operand.vmem [shape: f32[1,128], index: 3, kind: input, shape index: {}]   ;;  %s889_s4 = inlined_call_operand.hbm [shape: f32[2,16,128], index: 4, kind: output, shape index: {0}]   ;;  %s890_s5 = inlined_call_operand.hbm [shape: f32[2,16,128], index: 5, kind: output, shape index: {1}]  }
   0x1   :  { %12 = vsyncpa [#allocation6], 0 }
   0x2   :  { %13 = vsyncpa [#allocation4], 0 }
   0x3   :  { %14 = vsyncpa [#allocation10], 0  ;;  %s627_s18 = smov [#allocation5]   ;;  %s628_s20 = smov [#allocation2]  }
   0x4   :  { %s32_s19 = sshll.u32 %s627_s18, 4  ;;  %s20_s21 = sshll.u32 %s628_s20, 4  ;;  %s33_s19 = int_to_ptr.vmem [resolvable:$true] %s32_s19  ;;  %s667_s21 = int_to_ptr.vmem [resolvable:$true] %s20_s21 }
   0x5   :  { %s509_s24 = scalar_lea.hbm %s886_s1, 256 }
   0x6   :  { %p510_p0 = scmp.ne.s32.totalorder %s886_s1, %s509_s24  ;;  %p513_p1 = scmp.lt.u32.totalorder %s509_s24, %s886_s1 }
   0x8   :  { %p515_p2 = pnand %p513_p1, %p510_p0 }
   0xa   :  { %518 = shalt.err (!%p515_p2)
}
   0xb   :  { %s519_s29 = scalar_lea.vmem %s33_s19, 256  ;;  %p524_p4 = scmp.lt.s32.totalorder %s33_s19, %s33_s19 }
   0xc   :  { %p520_p3 = scmp.ne.s32.totalorder %s33_s19, %s519_s29  ;;  %p525_p5 = scmp.lt.s32.totalorder %s519_s29, %s519_s29 }
   0xe   :  { %p526_p6 = por %p525_p5, %p524_p4 }
  0x10   :  { %p527_p7 = pnand %p526_p6, %p520_p3 }
  0x12   :  { %530 = shalt.err (!%p527_p7)
}
  0x13   :  { %s629_s30 = smov 64   ;;  %s630_s6 = smov 4  }
  0x14   :  { %38 = dma.hbm_to_vmem [thread:$0]  %s886_s1, 256, %s33_s19, [#allocation6], %s629_s30, %s629_s30, %s630_s6  }
  0x15   :  { %s531_s11 = scalar_lea.hbm %s885_s0, 256 }
  0x16   :  { %p532_p8 = scmp.ne.s32.totalorder %s885_s0, %s531_s11  ;;  %p535_p9 = scmp.lt.u32.totalorder %s531_s11, %s885_s0 }
  0x18   :  { %p537_p10 = pnand %p535_p9, %p532_p8 }
  0x1a   :  { %540 = shalt.err (!%p537_p10)
}
  0x1b   :  { %s541_s16 = scalar_lea.vmem %s667_s21, 256  ;;  %p546_p12 = scmp.lt.s32.totalorder %s667_s21, %s667_s21 }
  0x1c   :  { %p542_p11 = scmp.ne.s32.totalorder %s667_s21, %s541_s16  ;;  %p547_p13 = scmp.lt.s32.totalorder %s541_s16, %s541_s16 }
  0x1e   :  { %p548_p0 = por %p547_p13, %p546_p12 }
  0x20   :  { %p549_p1 = pnand %p548_p0, %p542_p11 }
  0x22   :  { %552 = shalt.err (!%p549_p1)
}
  0x23   :  { %26 = dma.hbm_to_vmem [thread:$0]  %s885_s0, 256, %s667_s21, [#allocation3], %s629_s30, %s629_s30, %s630_s6  }
  0x24   :  { %s631_s18 = smov [#allocation7]   ;;  %s553_s23 = scalar_lea.hbm %s887_s2, 1536 }
  0x25   :  { %s44_s19 = sshll.u32 %s631_s18, 4  ;;  %p554_p2 = scmp.ne.s32.totalorder %s887_s2, %s553_s23  ;;  %s45_s19 = int_to_ptr.vmem [resolvable:$true] %s44_s19 }
  0x26   :  { %p557_p3 = scmp.lt.u32.totalorder %s553_s23, %s887_s2 }
  0x28   :  { %p559_p4 = pnand %p557_p3, %p554_p2 }
  0x2a   :  { %562 = shalt.err (!%p559_p4)
}
  0x2b   :  { %s563_s28 = scalar_lea.vmem %s45_s19, 1536  ;;  %p568_p6 = scmp.lt.s32.totalorder %s45_s19, %s45_s19 }
  0x2c   :  { %p564_p5 = scmp.ne.s32.totalorder %s45_s19, %s563_s28  ;;  %p569_p7 = scmp.lt.s32.totalorder %s563_s28, %s563_s28 }
  0x2e   :  { %p570_p8 = por %p569_p7, %p568_p6 }
  0x30   :  { %p571_p9 = pnand %p570_p8, %p564_p5 }
  0x32   :  { %574 = shalt.err (!%p571_p9)
}
  0x33   :  { %50 = dma.hbm_to_vmem [thread:$0]  %s887_s2, 1536, %s45_s19, [#allocation6], %s629_s30, %s629_s30, %s630_s6  }
  0x34   :  { %619 = dma.done.wait [#allocation3], 256  }
  0x35   :  { %620 = vsyncadd [#allocation3], 4294967040 }
  0x36   :  { %621 = dma.done.wait [#allocation6], 1792  }
  0x37   :  { %622 = vsyncadd [#allocation6], 4294965504  ;;  %v632_v0 = vmov 0   ;;  %v426_v1 = vld [vmem:[#allocation2] sm:$0xff]   ;;  %v434_v2 = vld [vmem:[#allocation5] sm:$0xff]   ;;  %vm87_vm0 = vcmask 1040384  }
  0x38   :  { %293 = vmatprep.subr.bf16.mxu0 %v632_v0  ;;  %443 = vmatprep.subr.bf16.mxu1 %v632_v0  ;;  %v441_v3 = vld [vmem:[#allocation2 + $0x8] sm:$0xff]   ;;  %v721_v4 = vunpack.c.l.bf16 %v426_v1  ;;  %v428_v5 = vunpack.c.h.bf16 %v426_v1  ;;  %v723_v6 = vunpack.c.l.bf16 %v434_v2  ;;  %v725_v7 = vunpack.c.h.bf16 %v434_v2  ;;  %v442_v8 = vld [vmem:[#allocation5 + $0x8] sm:$0xff]   ;;  %v497_v13 = vld [vmem:[#allocation7] sm:$0xff]   ;;  %s634_s6 = smov [#allocation9]  }
  0x39   :  { %v727_v9 = vunpack.c.l.bf16 %v441_v3  ;;  %v432_v10 = vunpack.c.h.bf16 %v441_v3  ;;  %v729_v11 = vunpack.c.l.bf16 %v442_v8  ;;  %v731_v12 = vunpack.c.h.bf16 %v442_v8  ;;  %294 = vmatpush1.bf16.msra.mxu0 %v497_v13  ;;  %455 = vmatpush1.bf16.msra.mxu1 %v497_v13  ;;  %v498_v20 = vld [vmem:[#allocation7 + $0x8] sm:$0xff]   ;;  %v499_v28 = vld [vmem:[#allocation7 + $0x10] sm:$0xff]   ;;  %v500_v32 = vld [vmem:[#allocation7 + $0x18] sm:$0xff]   ;;  %s391_s7 = sshll.u32 %s634_s6, 4  ;;  %s392_s7 = int_to_ptr.vmem [resolvable:$true] %s391_s7 }
  0x3a   :  { %v89_v14 = vrot.slane %v428_v5, 7  ;;  %v477_v15 = vpack.i.bf16 %v428_v5, %v721_v4  ;;  %v88_v16 = vrot.slane %v721_v4, 7  ;;  %v482_v21 = vpack.i.bf16 %v725_v7, %v723_v6  ;;  %295 = vmatprep.subr.bf16.mxu0 %v632_v0  ;;  %444 = vmatprep.subr.bf16.mxu1 %v632_v0  ;;  %v501_v47 = vld [vmem:[#allocation7 + $0x20] sm:$0xff]   ;;  %v502_v54 = vld [vmem:[#allocation7 + $0x28] sm:$0xff]   ;;  %v503_v55 = vld [vmem:[#allocation7 + $0x30] sm:$0xff]  }
  0x3b   :  { %v92_v17 = vrot.slane %v432_v10, 7  ;;  %v117_v18 = vrot.slane %v432_v10, 1  ;;  %v487_v19 = vpack.i.bf16 %v432_v10, %v727_v9  ;;  %v91_v22 = vrot.slane %v727_v9, 7  ;;  %v504_v56 = vld [vmem:[#allocation7 + $0x38] sm:$0xff]   ;;  %v505_v57 = vld [vmem:[#allocation7 + $0x40] sm:$0xff]   ;;  %v506_v58 = vld [vmem:[#allocation7 + $0x48] sm:$0xff]  }
  0x3c   :  { %478 = vrot.lane.b32.xlu0 %v477_v15, %s629_s30  ;;  %v116_v23 = vrot.slane %v727_v9, 1  ;;  %v492_v24 = vpack.i.bf16 %v731_v12, %v729_v11  ;;  %vm112_vm1 = vcmask 1046528   ;;  %v749_v25 = vsel %vm87_vm0, %v88_v16, %v89_v14  ;;  %v507_v59 = vld [vmem:[#allocation7 + $0x50] sm:$0xff]   ;;  %v508_v60 = vld [vmem:[#allocation7 + $0x58] sm:$0xff]  }
  0x3d   :  { %488 = vrot.lane.b32.xlu1 %v487_v19, %s629_s30  ;;  %v757_v27 = vsel %vm87_vm0, %v91_v22, %v92_v17  ;;  %296 = vmatpush1.bf16.msra.mxu0 %v498_v20  ;;  %v113_v29 = vrot.slane %v721_v4, 1  ;;  %v114_v30 = vrot.slane %v428_v5, 1  ;;  %v95_v31 = vrot.slane %v725_v7, 7 }
  0x3e   :  { %v752_v26 = vsel %vm112_vm1, %v116_v23, %v117_v18  ;;  %456 = vmatpush1.bf16.msra.mxu1 %v498_v20  ;;  %297 = vmatprep.subr.bf16.mxu0 %v632_v0  ;;  %vm161_vm2 = vcmask 523264   ;;  %v122_v35 = vrot.slane %v729_v11, 1  ;;  %v119_v37 = vrot.slane %v723_v6, 1 }
  0x3f   :  { %445 = vmatprep.subr.bf16.mxu1 %v632_v0  ;;  %v115_v33 = vsel %vm112_vm1, %v113_v29, %v114_v30  ;;  %v133_v34 = vsel %vm112_vm1, %v114_v30, 0.0  ;;  %v98_v38 = vrot.slane %v731_v12, 7  ;;  %v120_v39 = vrot.slane %v725_v7, 1 }
  0x40   :  { %483 = vrot.lane.b32.xlu0 %v482_v21, %s629_s30  ;;  %v171_v36 = vpack.c.bf16 %v133_v34, %v115_v33  ;;  %v94_v40 = vrot.slane %v723_v6, 7  ;;  %v776_v41 = vsel %vm112_vm1, %v117_v18, 0.0  ;;  %v123_v42 = vrot.slane %v731_v12, 1 }
  0x41   :  { %493 = vrot.lane.b32.xlu1 %v492_v24, %s629_s30  ;;  %298 = vmatpush1.bf16.msra.mxu0 %v499_v28  ;;  %v121_v43 = vsel %vm112_vm1, %v119_v37, %v120_v39  ;;  %v135_v44 = vsel %vm112_vm1, %v120_v39, 0.0  ;;  %v173_v45 = vpack.c.bf16 %v776_v41, %v752_v26  ;;  %v97_v46 = vrot.slane %v729_v11, 7 }
  0x42   :  { %457 = vmatpush1.bf16.msra.mxu1 %v499_v28  ;;  %299 = vmatprep.subr.bf16.mxu0 %v632_v0  ;;  %v175_v48 = vpack.c.bf16 %v135_v44, %v121_v43  ;;  %v787_v49 = vsel %vm87_vm0, %v94_v40, %v95_v31  ;;  %v790_v50 = vsel %vm112_vm1, %v122_v35, %v123_v42  ;;  %v795_v51 = vsel %vm112_vm1, %v123_v42, 0.0 }
  0x43   :  { %446 = vmatprep.subr.bf16.mxu1 %v632_v0  ;;  %421 = vmatprep.mubr.msk.bf16.mxu0 %vm161_vm2, %v171_v36  ;;  %v800_v52 = vsel %vm87_vm0, %v97_v46, %v98_v38  ;;  %v177_v53 = vpack.c.bf16 %v795_v51, %v790_v50  ;;  %v108_v62 = vsel %vm87_vm0, 0.0, %v88_v16  ;;  %v109_v3 = vsel %vm87_vm0, 0.0, %v91_v22 }
  0x44   :  { %423 = vmatprep.mubr.msk.bf16.mxu1 %vm161_vm2, %v175_v48  ;;  %v110_v4 = vsel %vm87_vm0, 0.0, %v94_v40  ;;  %v111_v18 = vsel %vm87_vm0, 0.0, %v97_v46 }
  0x45   :  { %300 = vmatpush1.bf16.msra.mxu0 %v500_v32 }
  0x46   :  { %458 = vmatpush1.bf16.msra.mxu1 %v500_v32  ;;  %301 = vmatprep.subr.bf16.mxu0 %v632_v0 }
  0x47   :  { %447 = vmatprep.subr.bf16.mxu1 %v632_v0 }
  0x49   :  { %302 = vmatpush1.bf16.msra.mxu0 %v501_v47 }
  0x4a   :  { %459 = vmatpush1.bf16.msra.mxu1 %v501_v47  ;;  %303 = vmatprep.subr.bf16.mxu0 %v632_v0 }
  0x4b   :  { %448 = vmatprep.subr.bf16.mxu1 %v632_v0 }
  0x4d   :  { %304 = vmatpush1.bf16.msra.mxu0 %v502_v54 }
  0x4e   :  { %460 = vmatpush1.bf16.msra.mxu1 %v502_v54  ;;  %305 = vmatprep.subr.bf16.mxu0 %v632_v0 }
  0x4f   :  { %449 = vmatprep.subr.bf16.mxu1 %v632_v0 }
  0x51   :  { %306 = vmatpush1.bf16.msra.mxu0 %v503_v55 }
  0x52   :  { %461 = vmatpush1.bf16.msra.mxu1 %v503_v55  ;;  %307 = vmatprep.subr.bf16.mxu0 %v632_v0 }
  0x53   :  { %450 = vmatprep.subr.bf16.mxu1 %v632_v0 }
  0x55   :  { %308 = vmatpush1.bf16.msra.mxu0 %v504_v56 }
  0x56   :  { %462 = vmatpush1.bf16.msra.mxu1 %v504_v56  ;;  %309 = vmatprep.subr.bf16.mxu0 %v632_v0 }
  0x57   :  { %451 = vmatprep.subr.bf16.mxu1 %v632_v0 }
  0x59   :  { %310 = vmatpush1.bf16.msra.mxu0 %v505_v57 }
  0x5a   :  { %463 = vmatpush1.bf16.msra.mxu1 %v505_v57  ;;  %311 = vmatprep.subr.bf16.mxu0 %v632_v0 }
  0x5b   :  { %452 = vmatprep.subr.bf16.mxu1 %v632_v0 }
  0x5d   :  { %312 = vmatpush1.bf16.msra.mxu0 %v506_v58 }
  0x5e   :  { %464 = vmatpush1.bf16.msra.mxu1 %v506_v58  ;;  %313 = vmatprep.subr.bf16.mxu0 %v632_v0 }
  0x5f   :  { %453 = vmatprep.subr.bf16.mxu1 %v632_v0 }
  0x61   :  { %314 = vmatpush1.bf16.msra.mxu0 %v507_v59 }
  0x62   :  { %465 = vmatpush1.bf16.msra.mxu1 %v507_v59  ;;  %315 = vmatprep.subr.bf16.mxu0 %v632_v0 }
  0x63   :  { %454 = vmatprep.subr.bf16.mxu1 %v632_v0 }
  0x65   :  { %316 = vmatpush1.bf16.msra.mxu0 %v508_v60 }
  0x66   :  { %466 = vmatpush1.bf16.msra.mxu1 %v508_v60 }
  0xae   :  { %v479_v61 = vpop.permute.xlu0 %478 }
  0xaf   :  { %v481_v63 = vunpack.i.h.bf16 %v479_v61  ;;  %v480_v1 = vunpack.i.l.bf16 %v479_v61  ;;  %v489_v2 = vpop.permute.xlu1 %488 }
  0xb0   :  { %v491_v5 = vunpack.i.h.bf16 %v489_v2  ;;  %v490_v7 = vunpack.i.l.bf16 %v489_v2 }
  0xb1   :  { %v162_v8 = vsel %vm161_vm2, %v108_v62, %v480_v1  ;;  %v163_v0 = vsel %vm161_vm2, %v749_v25, %v481_v63  ;;  %v408_v25 = vld [vmem:[%s888_s3] ss:$0 sm:$0xff]  ;;  %s633_s3 = smov [#allocation8]  }
  0xb2   :  { %v484_v10 = vpop.permute.xlu0 %483  ;;  %v170_v12 = vpack.c.bf16 %v163_v0, %v162_v8  ;;  %v164_v13 = vsel %vm161_vm2, %v109_v3, %v490_v7  ;;  %v165_v9 = vsel %vm161_vm2, %v757_v27, %v491_v5  ;;  %s379_s30 = sshll.u32 %s633_s3, 4  ;;  %s854_s30 = int_to_ptr.vmem [resolvable:$true] %s379_s30 }
  0xb3   :  { %v486_v14 = vunpack.i.h.bf16 %v484_v10  ;;  %v485_v15 = vunpack.i.l.bf16 %v484_v10  ;;  %v494_v16 = vpop.permute.xlu1 %493  ;;  %v172_v17 = vpack.c.bf16 %v165_v9, %v164_v13  ;;  %s575_s8 = scalar_lea.vmem %s854_s30, 512  ;;  %p580_p11 = scmp.lt.s32.totalorder %s854_s30, %s854_s30 }
  0xb4   :  { %326 = vmatmul.mubr.bf16.vlgmr.msra.gmra.mrb[0].mxu0 %v170_v12  ;;  %v496_v19 = vunpack.i.h.bf16 %v494_v16  ;;  %v495_v20 = vunpack.i.l.bf16 %v494_v16  ;;  %p576_p10 = scmp.ne.s32.totalorder %s854_s30, %s575_s8  ;;  %p581_p12 = scmp.lt.s32.totalorder %s575_s8, %s575_s8 }
  0xb5   :  { %v166_v6 = vsel %vm161_vm2, %v110_v4, %v485_v15  ;;  %v167_v21 = vsel %vm161_vm2, %v787_v49, %v486_v14  ;;  %422 = vmatprep.mubr.msk.bf16.mxu0 %vm161_vm2, %v173_v45 }
  0xb6   :  { %v174_v22 = vpack.c.bf16 %v167_v21, %v166_v6  ;;  %v168_v23 = vsel %vm161_vm2, %v111_v18, %v495_v20  ;;  %v169_v11 = vsel %vm161_vm2, %v800_v52, %v496_v19  ;;  %p582_p13 = por %p581_p12, %p580_p11 }
  0xb7   :  { %v176_v24 = vpack.c.bf16 %v169_v11, %v168_v23 }
  0xb8   :  { %342 = vmatmul.mubr.bf16.vlgmr.msra.gmra.mrb[0].mxu1 %v174_v22  ;;  %p583_p0 = pnand %p582_p13, %p576_p10 }
  0xb9   :  { %424 = vmatprep.mubr.msk.bf16.mxu1 %vm161_vm2, %v177_v53 }
  0xbc   :  { %334 = vmatmul.mubr.bf16.gmra.mrb[4].mxu0 %v172_v17 }
  0xc0   :  { %350 = vmatmul.mubr.bf16.gmra.mrb[4].mxu1 %v176_v24 }
 0x187   :  { %v327_v26 = vpop.f32.mrb[0].mxu0 }
 0x188   :  { %v328_v27 = vadd.f32 %v408_v25, %v327_v26  ;;  %v329_v28 = vpop.f32.mrb[1].mxu0 }
 0x189   :  { %v330_v29 = vpop.f32.mrb[2].mxu0 }
 0x18a   :  { %v358_v30 = vmax.f32 %v328_v27, 0.0  ;;  %v331_v31 = vadd.f32 %v408_v25, %v330_v29  ;;  %v332_v32 = vpop.f32.mrb[3].mxu0 }
 0x18b   :  { %v343_v33 = vpop.f32.mrb[0].mxu1 }
 0x18c   :  { %366 = vst [vmem:[#allocation8] sm:$0xff] %v358_v30  ;;  %v359_v34 = vmax.f32 %v331_v31, 0.0  ;;  %v344_v35 = vadd.f32 %v408_v25, %v343_v33  ;;  %v345_v36 = vpop.f32.mrb[1].mxu1 }
 0x18d   :  { %v346_v37 = vpop.f32.mrb[2].mxu1 }
 0x18e   :  { %367 = vst [vmem:[#allocation8 + $0x8] sm:$0xff] %v359_v34  ;;  %v362_v38 = vmax.f32 %v344_v35, 0.0  ;;  %v347_v39 = vadd.f32 %v408_v25, %v346_v37  ;;  %v348_v40 = vpop.f32.mrb[3].mxu1 }
 0x18f   :  { %v335_v41 = vpop.f32.mrb[4].mxu0 }
 0x190   :  { %370 = vst [vmem:[#allocation9] sm:$0xff] %v362_v38  ;;  %v363_v42 = vmax.f32 %v347_v39, 0.0  ;;  %v336_v43 = vadd.f32 %v408_v25, %v335_v41  ;;  %v337_v44 = vpop.f32.mrb[5].mxu0 }
 0x191   :  { %v338_v45 = vpop.f32.mrb[6].mxu0 }
 0x192   :  { %371 = vst [vmem:[#allocation9 + $0x8] sm:$0xff] %v363_v42  ;;  %v360_v46 = vmax.f32 %v336_v43, 0.0  ;;  %v339_v47 = vadd.f32 %v408_v25, %v338_v45  ;;  %v340_v48 = vpop.f32.mrb[7].mxu0 }
 0x193   :  { %v351_v49 = vpop.f32.mrb[4].mxu1 }
 0x194   :  { %368 = vst [vmem:[#allocation8 + $0x10] sm:$0xff] %v360_v46  ;;  %v361_v50 = vmax.f32 %v339_v47, 0.0  ;;  %v352_v51 = vadd.f32 %v408_v25, %v351_v49  ;;  %v353_v52 = vpop.f32.mrb[5].mxu1 }
 0x195   :  { %v354_v53 = vpop.f32.mrb[6].mxu1 }
 0x196   :  { %369 = vst [vmem:[#allocation8 + $0x18] sm:$0xff] %v361_v50  ;;  %v364_v54 = vmax.f32 %v352_v51, 0.0  ;;  %v355_v55 = vadd.f32 %v408_v25, %v354_v53  ;;  %v356_v56 = vpop.f32.mrb[7].mxu1 }
 0x197   :  { %586 = shalt.err (!%p583_p0)
}
 0x198   :  { %s587_s11 = scalar_lea.hbm %s889_s4, 512 }
 0x199   :  { %p588_p1 = scmp.ne.s32.totalorder %s889_s4, %s587_s11  ;;  %p591_p2 = scmp.lt.u32.totalorder %s587_s11, %s889_s4 }
 0x19b   :  { %p593_p3 = pnand %p591_p2, %p588_p1 }
 0x19d   :  { %596 = shalt.err (!%p593_p3)
}
 0x19e   :  { %s635_s16 = smov 128   ;;  %s636_s1 = smov 8   ;;  %372 = vst [vmem:[#allocation9 + $0x10] sm:$0xff] %v364_v54  ;;  %v365_v57 = vmax.f32 %v355_v55, 0.0 }
 0x19f   :  { %385 = dma.vmem_to_hbm [thread:$0]  %s854_s30, 512, %s889_s4, [#allocation4], %s635_s16, %s635_s16, %s636_s1  }
 0x1a0   :  { %373 = vst [vmem:[#allocation9 + $0x18] sm:$0xff] %v365_v57  ;;  %s597_s19 = scalar_lea.vmem %s392_s7, 512  ;;  %p602_p5 = scmp.lt.s32.totalorder %s392_s7, %s392_s7 }
 0x1a1   :  { %p598_p4 = scmp.ne.s32.totalorder %s392_s7, %s597_s19  ;;  %p603_p6 = scmp.lt.s32.totalorder %s597_s19, %s597_s19 }
 0x1a3   :  { %p604_p7 = por %p603_p6, %p602_p5 }
 0x1a5   :  { %p605_p8 = pnand %p604_p7, %p598_p4 }
 0x1a7   :  { %608 = shalt.err (!%p605_p8)
}
 0x1a8   :  { %s609_s23 = scalar_lea.hbm %s890_s5, 512 }
 0x1a9   :  { %p610_p9 = scmp.ne.s32.totalorder %s890_s5, %s609_s23  ;;  %p613_p10 = scmp.lt.u32.totalorder %s609_s23, %s890_s5 }
 0x1ab   :  { %p615_p11 = pnand %p613_p10, %p610_p9 }
 0x1ad   :  { %618 = shalt.err (!%p615_p11)
}
 0x1ae   :  { %397 = dma.vmem_to_hbm [thread:$0]  %s392_s7, 512, %s890_s5, [#allocation10], %s635_s16, %s635_s16, %s636_s1  }
 0x1af   :  { %623 = dma.done.wait [#allocation4], 512  }
 0x1b0   :  { %624 = vsyncadd [#allocation4], 4294966784 }
 0x1b1   :  { %625 = dma.done.wait [#allocation10], 512  }
 0x1b2   :  { %626 = vsyncadd [#allocation10], 4294966784 }
 0x1b3   :  { %404 = vsyncpa [#allocation3], 1 }
 0x1b4   :  { %405 = vsyncpa [#allocation6], 1 }
 0x1b5   :  { %406 = vsyncpa [#allocation4], 1 }
 0x1b6   :  { %407 = vsyncpa [#allocation10], 1 }

</bundles_post_ra>
